<compile_context>
chip_gen: v7x
topology: tpu7x:2x2x1
jax: 0.10.0
libtpu: 0.0.40
codegen_flags: <defaults>
</compile_context>

<pallas_src>
import functools

import jax
import jax.numpy as jnp
from jax import lax
from jax.experimental import pallas as pl
from jax.experimental.pallas import tpu as pltpu


def _warp_kernel(flow_ref, src_ref, out_ref, acc_ref, *, H, W, TK, TP):
    """One (batch n, pixel-tile t, source-chunk k) grid step.

    flow_ref: (2, TP)  f32    flow (dy, dx) for this tile's output pixels
    src_ref : (C, TK)  bf16   source pixels [k*TK, (k+1)*TK)
    out_ref : (C, TP)  src dtype
    acc_ref : (C, TP)  f32    accumulator, carried across the k axis
    """
    t = pl.program_id(1)          # output-pixel tile index
    k = pl.program_id(2)          # source-pixel chunk index

    @pl.when(k == 0)
    def _init():
        acc_ref[...] = jnp.zeros_like(acc_ref)

    # --- sample coordinates for this tile (identity grid built in-kernel) ---
    # flattened output-pixel index p = t*TP + lane.  p//W and p%W are computed
    # in f32 (exact for HW < 2^24); the +0.5 keeps floor() robust to rounding
    # of the f32 divide.  Avoids vector integer div/mod entirely.
    p = (lax.broadcasted_iota(jnp.int32, (1, TP), 1) + t * TP).astype(jnp.float32)
    gy = jnp.floor((p + 0.5) / float(W))
    gx = p - gy * float(W)

    y = gy + flow_ref[0:1, :]     # sample row
    x = gx + flow_ref[1:2, :]     # sample col

    y0f = jnp.floor(y)
    x0f = jnp.floor(x)
    wy1 = y - y0f
    wy0 = 1.0 - wy1
    wx1 = x - x0f
    wx0 = 1.0 - wx1
    y0 = y0f.astype(jnp.int32)
    x0 = x0f.astype(jnp.int32)

    def _inb(yi, xi):             # zero-padding validity mask (grid_sample 'zeros')
        return ((yi >= 0) & (yi <= H - 1) &
                (xi >= 0) & (xi <= W - 1)).astype(jnp.float32)

    w00 = wy0 * wx0 * _inb(y0,     x0)          # corner (y0, x0)
    w01 = wy0 * wx1 * _inb(y0,     x0 + 1)      # corner (y0, x1)
    w10 = wy1 * wx0 * _inb(y0 + 1, x0)          # corner (y1, x0)
    w11 = wy1 * wx1 * _inb(y0 + 1, x0 + 1)      # corner (y1, x1)

    idx_tl = y0 * W + x0                        # (1, TP) flattened top-left index

    # --- fused one-hot bilinear weight chunk, (TK_src, TP_out), int32 compares ---
    q = lax.broadcasted_iota(jnp.int32, (TK, TP), 0) + k * TK
    d = q - idx_tl
    wchunk = jnp.where(d == 0, w00,
             jnp.where(d == 1, w01,
             jnp.where(d == W, w10,
             jnp.where(d == W + 1, w11, 0.0)))).astype(jnp.bfloat16)

    # --- MXU contraction: out[c, p] += sum_q src[c, q] * w[q, p] ---
    acc_ref[...] += jnp.dot(src_ref[...], wchunk,
                            preferred_element_type=jnp.float32)

    @pl.when(k == pl.num_programs(2) - 1)
    def _finalize():
        out_ref[...] = acc_ref[...].astype(out_ref.dtype)


def _pick_tile(total, cap):
    """Largest multiple of 128 that divides `total` and is <= cap; else `total`."""
    if total % 128 != 0:
        return total
    tile = min(max(128, (cap // 128) * 128), total)
    while total % tile != 0:
        tile -= 128
    return tile


def spatial_transformer(src, flow, *, tile_p=128, tile_k=2048):
    """Pallas equivalent of SpatialTransformer.forward (2-D, bilinear, zeros)."""
    N, C, H, W = src.shape
    assert flow.shape == (N, 2, H, W)
    assert H >= 2 and W >= 2
    HW = H * W
    assert HW < (1 << 24)

    TP = _pick_tile(HW, tile_p)   # output-pixel tile (lane dim, multiple of 128)
    TK = _pick_tile(HW, tile_k)   # source-pixel chunk (contraction dim)

    # bf16 source halves HBM traffic and hits the bf16 MXU path; flow stays f32
    # so sample coordinates keep full precision.  Output is the source dtype.
    src_f = src.reshape(N, C, HW).astype(jnp.bfloat16)
    flow_f = flow.reshape(N, 2, HW).astype(jnp.float32)

    kernel = functools.partial(_warp_kernel, H=H, W=W, TK=TK, TP=TP)

    out = pl.pallas_call(
        kernel,
        out_shape=jax.ShapeDtypeStruct((N, C, HW), src.dtype),
        grid_spec=pltpu.PrefetchScalarGridSpec(
            num_scalar_prefetch=0,
            grid=(N, HW // TP, HW // TK),
            in_specs=[
                pl.BlockSpec((None, 2, TP), lambda n, t, k: (n, 0, t)),  # flow tile
                pl.BlockSpec((None, C, TK), lambda n, t, k: (n, 0, k)),  # src chunk
            ],
            out_specs=pl.BlockSpec((None, C, TP), lambda n, t, k: (n, 0, t)),
            scratch_shapes=[pltpu.VMEM((C, TP), jnp.float32)],
        ),
        compiler_params=pltpu.CompilerParams(
            dimension_semantics=("parallel", "parallel", "arbitrary"),
            vmem_limit_bytes=32 * 1024 * 1024,
        ),
    )(flow_f, src_f)

    return out.reshape(N, C, H, W)


def _reference_warp(src, flow):
    """Pure-JAX reference of grid_sample(align_corners=True, bilinear, zeros)."""
    N, C, H, W = src.shape
    gy, gx = jnp.meshgrid(jnp.arange(H, dtype=jnp.float32),
                          jnp.arange(W, dtype=jnp.float32), indexing="ij")

    def one(src_n, flow_n):
        y = gy + flow_n[0]
        x = gx + flow_n[1]
        y0 = jnp.floor(y); x0 = jnp.floor(x)
        y1 = y0 + 1.0;     x1 = x0 + 1.0
        wy1 = y - y0; wy0 = 1.0 - wy1
        wx1 = x - x0; wx0 = 1.0 - wx1

        def samp(yi, xi):
            valid = ((yi >= 0) & (yi <= H - 1) &
                     (xi >= 0) & (xi <= W - 1)).astype(src_n.dtype)
            yc = jnp.clip(yi, 0, H - 1).astype(jnp.int32)
            xc = jnp.clip(xi, 0, W - 1).astype(jnp.int32)
            return src_n[:, yc, xc] * valid[None]

        return (samp(y0, x0) * (wy0 * wx0)[None] +
                samp(y0, x1) * (wy0 * wx1)[None] +
                samp(y1, x0) * (wy1 * wx0)[None] +
                samp(y1, x1) * (wy1 * wx1)[None])

    return jax.vmap(one)(src, flow)


if __name__ == "__main__":
    key = jax.random.PRNGKey(0)
    k_src, k_flow = jax.random.split(key)

    N, C, H, W = 2, 4, 16, 16
    src = jax.random.normal(k_src, (N, C, H, W), dtype=jnp.float32)
    # flow large enough that some sample locations fall outside (tests zero padding)
    flow = 3.0 * jax.random.normal(k_flow, (N, 2, H, W), dtype=jnp.float32)

    ref = _reference_warp(src, flow)

    # Default tiling: k-chunk == HW, so the src slab stays VMEM-resident
    # across the pixel-tile axis.
    out = spatial_transformer(src, flow)
    jax.block_until_ready(out)
    assert out.shape == (N, C, H, W)
    # bf16 MXU operands (per the review) -> tolerance loosened vs f32 reference.
    err = jnp.max(jnp.abs(out - ref))
    assert jnp.allclose(out, ref, atol=5e-2, rtol=0.0), f"max abs err {err:.3e}"

    # Small tiles: exercises both the pixel-tile axis and the k-chunk
    # accumulation path (grid = (2, 2, 2)).
    out2 = spatial_transformer(src, flow, tile_p=128, tile_k=128)
    jax.block_until_ready(out2)
    err2 = jnp.max(jnp.abs(out2 - ref))
    assert jnp.allclose(out2, ref, atol=5e-2, rtol=0.0), f"max abs err {err2:.3e}"

    print("KERNEL_OK")
</pallas_src>

<mosaic_0001>
module attributes {stable_mosaic.version = 11 : i64} {
  func.func @_warp_kernel(%arg0: i32, %arg1: i32, %arg2: i32, %arg3: memref<1x2x128xf32, #tpu.memory_space<vmem>>, %arg4: memref<1x4x256xbf16, #tpu.memory_space<vmem>>, %arg5: memref<1x4x128xf32, #tpu.memory_space<vmem>>, %arg6: memref<4x128xf32, #tpu.memory_space<vmem>>) attributes {dimension_semantics = [#tpu.dimension_semantics<parallel>, #tpu.dimension_semantics<parallel>, #tpu.dimension_semantics<arbitrary>], iteration_bounds = array<i64: 2, 2, 1>, scalar_prefetch = 0 : i64, scratch_operands = 1 : i64, tpu.core_type = #tpu.core_type<tc>, window_params = [{transform_indices = @transform_0, window_bounds = array<i64: 1, 2, 128>}, {transform_indices = @transform_1, window_bounds = array<i64: 1, 4, 256>}, {transform_indices = @transform_2, window_bounds = array<i64: 1, 4, 128>}]} {
    %c0_i32 = arith.constant 0 : i32
    %0 = arith.cmpi eq, %arg2, %c0_i32 : i32
    %1 = arith.extui %0 : i1 to i32
    %c0_i32_0 = arith.constant 0 : i32
    %2 = arith.cmpi ne, %1, %c0_i32_0 : i32
    scf.if %2 {
      %cst_41 = arith.constant 0.000000e+00 : f32
      %140 = vector.broadcast %cst_41 : f32 to vector<4x128xf32>
      %c0_42 = arith.constant 0 : index
      %c0_43 = arith.constant 0 : index
      %141 = vector.load %arg6[%c0_42, %c0_43] : memref<4x128xf32, #tpu.memory_space<vmem>>, vector<4x128xf32>
      tpu.vector_store %arg6[%c0_42, %c0_43], %140 {strides = array<i32>} : memref<4x128xf32, #tpu.memory_space<vmem>>, vector<4x128xf32>,
    } else {
    }
    %3 = tpu.iota {dimensions = array<i32: 1>} : vector<1x128xi32>
    %c128_i32 = arith.constant 128 : i32
    %4 = arith.muli %arg1, %c128_i32 : i32
    %5 = vector.broadcast %4 : i32 to vector<1x128xi32>
    %6 = arith.addi %3, %5 : vector<1x128xi32>
    %7 = arith.sitofp %6 : vector<1x128xi32> to vector<1x128xf32>
    %cst = arith.constant 5.000000e-01 : f32
    %8 = vector.broadcast %cst : f32 to vector<1x128xf32>
    %9 = arith.addf %7, %8 : vector<1x128xf32>
    %cst_1 = arith.constant 1.600000e+01 : f32
    %10 = vector.broadcast %cst_1 : f32 to vector<1x128xf32>
    %11 = arith.divf %9, %10 : vector<1x128xf32>
    %12 = math.floor %11 : vector<1x128xf32>
    %cst_2 = arith.constant 1.600000e+01 : f32
    %13 = vector.broadcast %cst_2 : f32 to vector<1x128xf32>
    %14 = arith.mulf %12, %13 : vector<1x128xf32>
    %15 = arith.subf %7, %14 : vector<1x128xf32>
    %c0 = arith.constant 0 : index
    %c0_3 = arith.constant 0 : index
    %c0_4 = arith.constant 0 : index
    %16 = vector.load %arg3[%c0, %c0_3, %c0_4] : memref<1x2x128xf32, #tpu.memory_space<vmem>>, vector<1x1x128xf32>
    %17 = vector.shape_cast %16 : vector<1x1x128xf32> to vector<1x128xf32>
    %18 = arith.addf %12, %17 : vector<1x128xf32>
    %c0_5 = arith.constant 0 : index
    %c1 = arith.constant 1 : index
    %c0_6 = arith.constant 0 : index
    %19 = vector.load %arg3[%c0_5, %c1, %c0_6] : memref<1x2x128xf32, #tpu.memory_space<vmem>>, vector<1x1x128xf32>
    %20 = vector.shape_cast %19 : vector<1x1x128xf32> to vector<1x128xf32>
    %21 = arith.addf %15, %20 : vector<1x128xf32>
    %22 = math.floor %18 : vector<1x128xf32>
    %23 = math.floor %21 : vector<1x128xf32>
    %24 = arith.subf %18, %22 : vector<1x128xf32>
    %cst_7 = arith.constant 1.000000e+00 : f32
    %25 = vector.broadcast %cst_7 : f32 to vector<1x128xf32>
    %26 = arith.subf %25, %24 : vector<1x128xf32>
    %27 = arith.subf %21, %23 : vector<1x128xf32>
    %cst_8 = arith.constant 1.000000e+00 : f32
    %28 = vector.broadcast %cst_8 : f32 to vector<1x128xf32>
    %29 = arith.subf %28, %27 : vector<1x128xf32>
    %30 = arith.fptosi %22 : vector<1x128xf32> to vector<1x128xi32>
    %31 = arith.fptosi %23 : vector<1x128xf32> to vector<1x128xi32>
    %32 = arith.mulf %26, %29 : vector<1x128xf32>
    %c0_i32_9 = arith.constant 0 : i32
    %33 = vector.broadcast %c0_i32_9 : i32 to vector<1x128xi32>
    %34 = arith.cmpi sge, %30, %33 : vector<1x128xi32>
    %c15_i32 = arith.constant 15 : i32
    %35 = vector.broadcast %c15_i32 : i32 to vector<1x128xi32>
    %36 = arith.cmpi sle, %30, %35 : vector<1x128xi32>
    %37 = arith.andi %34, %36 : vector<1x128xi1>
    %c0_i32_10 = arith.constant 0 : i32
    %38 = vector.broadcast %c0_i32_10 : i32 to vector<1x128xi32>
    %39 = arith.cmpi sge, %31, %38 : vector<1x128xi32>
    %40 = arith.andi %37, %39 : vector<1x128xi1>
    %c15_i32_11 = arith.constant 15 : i32
    %41 = vector.broadcast %c15_i32_11 : i32 to vector<1x128xi32>
    %42 = arith.cmpi sle, %31, %41 : vector<1x128xi32>
    %43 = arith.andi %40, %42 : vector<1x128xi1>
    %44 = arith.extui %43 : vector<1x128xi1> to vector<1x128xi32>
    %45 = arith.sitofp %44 : vector<1x128xi32> to vector<1x128xf32>
    %46 = arith.mulf %32, %45 : vector<1x128xf32>
    %47 = arith.mulf %26, %27 : vector<1x128xf32>
    %c1_i32 = arith.constant 1 : i32
    %48 = vector.broadcast %c1_i32 : i32 to vector<1x128xi32>
    %49 = arith.addi %31, %48 : vector<1x128xi32>
    %c0_i32_12 = arith.constant 0 : i32
    %50 = vector.broadcast %c0_i32_12 : i32 to vector<1x128xi32>
    %51 = arith.cmpi sge, %30, %50 : vector<1x128xi32>
    %c15_i32_13 = arith.constant 15 : i32
    %52 = vector.broadcast %c15_i32_13 : i32 to vector<1x128xi32>
    %53 = arith.cmpi sle, %30, %52 : vector<1x128xi32>
    %54 = arith.andi %51, %53 : vector<1x128xi1>
    %c0_i32_14 = arith.constant 0 : i32
    %55 = vector.broadcast %c0_i32_14 : i32 to vector<1x128xi32>
    %56 = arith.cmpi sge, %49, %55 : vector<1x128xi32>
    %57 = arith.andi %54, %56 : vector<1x128xi1>
    %c15_i32_15 = arith.constant 15 : i32
    %58 = vector.broadcast %c15_i32_15 : i32 to vector<1x128xi32>
    %59 = arith.cmpi sle, %49, %58 : vector<1x128xi32>
    %60 = arith.andi %57, %59 : vector<1x128xi1>
    %61 = arith.extui %60 : vector<1x128xi1> to vector<1x128xi32>
    %62 = arith.sitofp %61 : vector<1x128xi32> to vector<1x128xf32>
    %63 = arith.mulf %47, %62 : vector<1x128xf32>
    %64 = arith.mulf %24, %29 : vector<1x128xf32>
    %c1_i32_16 = arith.constant 1 : i32
    %65 = vector.broadcast %c1_i32_16 : i32 to vector<1x128xi32>
    %66 = arith.addi %30, %65 : vector<1x128xi32>
    %c0_i32_17 = arith.constant 0 : i32
    %67 = vector.broadcast %c0_i32_17 : i32 to vector<1x128xi32>
    %68 = arith.cmpi sge, %66, %67 : vector<1x128xi32>
    %c15_i32_18 = arith.constant 15 : i32
    %69 = vector.broadcast %c15_i32_18 : i32 to vector<1x128xi32>
    %70 = arith.cmpi sle, %66, %69 : vector<1x128xi32>
    %71 = arith.andi %68, %70 : vector<1x128xi1>
    %c0_i32_19 = arith.constant 0 : i32
    %72 = vector.broadcast %c0_i32_19 : i32 to vector<1x128xi32>
    %73 = arith.cmpi sge, %31, %72 : vector<1x128xi32>
    %74 = arith.andi %71, %73 : vector<1x128xi1>
    %c15_i32_20 = arith.constant 15 : i32
    %75 = vector.broadcast %c15_i32_20 : i32 to vector<1x128xi32>
    %76 = arith.cmpi sle, %31, %75 : vector<1x128xi32>
    %77 = arith.andi %74, %76 : vector<1x128xi1>
    %78 = arith.extui %77 : vector<1x128xi1> to vector<1x128xi32>
    %79 = arith.sitofp %78 : vector<1x128xi32> to vector<1x128xf32>
    %80 = arith.mulf %64, %79 : vector<1x128xf32>
    %81 = arith.mulf %24, %27 : vector<1x128xf32>
    %c1_i32_21 = arith.constant 1 : i32
    %82 = vector.broadcast %c1_i32_21 : i32 to vector<1x128xi32>
    %83 = arith.addi %30, %82 : vector<1x128xi32>
    %c1_i32_22 = arith.constant 1 : i32
    %84 = vector.broadcast %c1_i32_22 : i32 to vector<1x128xi32>
    %85 = arith.addi %31, %84 : vector<1x128xi32>
    %c0_i32_23 = arith.constant 0 : i32
    %86 = vector.broadcast %c0_i32_23 : i32 to vector<1x128xi32>
    %87 = arith.cmpi sge, %83, %86 : vector<1x128xi32>
    %c15_i32_24 = arith.constant 15 : i32
    %88 = vector.broadcast %c15_i32_24 : i32 to vector<1x128xi32>
    %89 = arith.cmpi sle, %83, %88 : vector<1x128xi32>
    %90 = arith.andi %87, %89 : vector<1x128xi1>
    %c0_i32_25 = arith.constant 0 : i32
    %91 = vector.broadcast %c0_i32_25 : i32 to vector<1x128xi32>
    %92 = arith.cmpi sge, %85, %91 : vector<1x128xi32>
    %93 = arith.andi %90, %92 : vector<1x128xi1>
    %c15_i32_26 = arith.constant 15 : i32
    %94 = vector.broadcast %c15_i32_26 : i32 to vector<1x128xi32>
    %95 = arith.cmpi sle, %85, %94 : vector<1x128xi32>
    %96 = arith.andi %93, %95 : vector<1x128xi1>
    %97 = arith.extui %96 : vector<1x128xi1> to vector<1x128xi32>
    %98 = arith.sitofp %97 : vector<1x128xi32> to vector<1x128xf32>
    %99 = arith.mulf %81, %98 : vector<1x128xf32>
    %c16_i32 = arith.constant 16 : i32
    %100 = vector.broadcast %c16_i32 : i32 to vector<1x128xi32>
    %101 = arith.muli %30, %100 : vector<1x128xi32>
    %102 = arith.addi %101, %31 : vector<1x128xi32>
    %103 = tpu.iota {dimensions = array<i32: 0>} : vector<256x128xi32>
    %c256_i32 = arith.constant 256 : i32
    %104 = arith.muli %arg2, %c256_i32 : i32
    %105 = vector.broadcast %104 : i32 to vector<256x128xi32>
    %106 = arith.addi %103, %105 : vector<256x128xi32>
    %107 = vector.broadcast %102 : vector<1x128xi32> to vector<256x128xi32>
    %108 = arith.subi %106, %107 : vector<256x128xi32>
    %c0_i32_27 = arith.constant 0 : i32
    %109 = vector.broadcast %c0_i32_27 : i32 to vector<256x128xi32>
    %110 = arith.cmpi eq, %108, %109 : vector<256x128xi32>
    %c1_i32_28 = arith.constant 1 : i32
    %111 = vector.broadcast %c1_i32_28 : i32 to vector<256x128xi32>
    %112 = arith.cmpi eq, %108, %111 : vector<256x128xi32>
    %c16_i32_29 = arith.constant 16 : i32
    %113 = vector.broadcast %c16_i32_29 : i32 to vector<256x128xi32>
    %114 = arith.cmpi eq, %108, %113 : vector<256x128xi32>
    %c17_i32 = arith.constant 17 : i32
    %115 = vector.broadcast %c17_i32 : i32 to vector<256x128xi32>
    %116 = arith.cmpi eq, %108, %115 : vector<256x128xi32>
    %cst_30 = arith.constant 0.000000e+00 : f32
    %117 = vector.shape_cast %99 : vector<1x128xf32> to vector<1x128xf32>
    %118 = vector.broadcast %117 : vector<1x128xf32> to vector<256x128xf32>
    %119 = vector.broadcast %cst_30 : f32 to vector<256x128xf32>
    %120 = arith.select %116, %118, %119 : vector<256x128xi1>, vector<256x128xf32>
    %121 = vector.shape_cast %80 : vector<1x128xf32> to vector<1x128xf32>
    %122 = vector.broadcast %121 : vector<1x128xf32> to vector<256x128xf32>
    %123 = arith.select %114, %122, %120 : vector<256x128xi1>, vector<256x128xf32>
    %124 = vector.shape_cast %63 : vector<1x128xf32> to vector<1x128xf32>
    %125 = vector.broadcast %124 : vector<1x128xf32> to vector<256x128xf32>
    %126 = arith.select %112, %125, %123 : vector<256x128xi1>, vector<256x128xf32>
    %127 = vector.shape_cast %46 : vector<1x128xf32> to vector<1x128xf32>
    %128 = vector.broadcast %127 : vector<1x128xf32> to vector<256x128xf32>
    %129 = arith.select %110, %128, %126 : vector<256x128xi1>, vector<256x128xf32>
    %130 = arith.truncf %129 : vector<256x128xf32> to vector<256x128xbf16>
    %c0_31 = arith.constant 0 : index
    %c0_32 = arith.constant 0 : index
    %131 = vector.load %arg6[%c0_31, %c0_32] : memref<4x128xf32, #tpu.memory_space<vmem>>, vector<4x128xf32>
    %c0_33 = arith.constant 0 : index
    %c0_34 = arith.constant 0 : index
    %c0_35 = arith.constant 0 : index
    %132 = vector.load %arg4[%c0_33, %c0_34, %c0_35] : memref<1x4x256xbf16, #tpu.memory_space<vmem>>, vector<1x4x256xbf16>
    %133 = vector.shape_cast %132 : vector<1x4x256xbf16> to vector<4x256xbf16>
    %cst_36 = arith.constant dense<0.000000e+00> : vector<4x128xf32>
    %134 = tpu.matmul %133, %130, %cst_36 {dimension_numbers = #tpu.dot_dimension_numbers<[1], [0], [0], [1], [0, 0, 1, 1], [], []>} : vector<4x256xbf16>, vector<256x128xbf16>, vector<4x128xf32> -> vector<4x128xf32>
    %135 = arith.addf %131, %134 : vector<4x128xf32>
    %c0_37 = arith.constant 0 : index
    %c0_38 = arith.constant 0 : index
    %136 = vector.load %arg6[%c0_37, %c0_38] : memref<4x128xf32, #tpu.memory_space<vmem>>, vector<4x128xf32>
    tpu.vector_store %arg6[%c0_37, %c0_38], %135 {strides = array<i32>} : memref<4x128xf32, #tpu.memory_space<vmem>>, vector<4x128xf32>,
    %c0_i32_39 = arith.constant 0 : i32
    %137 = arith.cmpi eq, %arg2, %c0_i32_39 : i32
    %138 = arith.extui %137 : i1 to i32
    %c0_i32_40 = arith.constant 0 : i32
    %139 = arith.cmpi ne, %138, %c0_i32_40 : i32
    scf.if %139 {
      %c0_41 = arith.constant 0 : index
      %c0_42 = arith.constant 0 : index
      %140 = vector.load %arg6[%c0_41, %c0_42] : memref<4x128xf32, #tpu.memory_space<vmem>>, vector<4x128xf32>
      %c0_43 = arith.constant 0 : index
      %c0_44 = arith.constant 0 : index
      %c0_45 = arith.constant 0 : index
      %141 = vector.load %arg5[%c0_43, %c0_44, %c0_45] : memref<1x4x128xf32, #tpu.memory_space<vmem>>, vector<1x4x128xf32>
      %142 = vector.shape_cast %141 : vector<1x4x128xf32> to vector<4x128xf32>
      %143 = vector.shape_cast %140 : vector<4x128xf32> to vector<1x4x128xf32>
      tpu.vector_store %arg5[%c0_43, %c0_44, %c0_45], %143 {strides = array<i32>} : memref<1x4x128xf32, #tpu.memory_space<vmem>>, vector<1x4x128xf32>,
    } else {
    }
    return
  }
  func.func @transform_0(%arg0: i32, %arg1: i32, %arg2: i32) -> (i32, i32, i32) {
    %c0_i32 = arith.constant 0 : i32
    %c0_i32_0 = arith.constant 0 : i32
    return %arg0, %c0_i32, %arg1 : i32, i32, i32
  }
  func.func @transform_1(%arg0: i32, %arg1: i32, %arg2: i32) -> (i32, i32, i32) {
    %c0_i32 = arith.constant 0 : i32
    %c0_i32_0 = arith.constant 0 : i32
    return %arg0, %c0_i32, %arg2 : i32, i32, i32
  }
  func.func @transform_2(%arg0: i32, %arg1: i32, %arg2: i32) -> (i32, i32, i32) {
    %c0_i32 = arith.constant 0 : i32
    %c0_i32_0 = arith.constant 0 : i32
    return %arg0, %c0_i32, %arg1 : i32, i32, i32
  }
}

</mosaic_0001>

<bundles_post_ra>
// kernel: tpu_custom_call.1
= control target key start
LH: loop header
LB: loop body
LE: loop exit
PB: predicated region body
PF: predicated region fallthrough
CT: control target
= control target key end

     0   :  { %s1960_s0 = inlined_call_operand.hbm [shape: f32[2,2,256], index: 0, kind: input, shape index: {}]   ;;  %s1961_s1 = inlined_call_operand.hbm [shape: bf16[2,4,256], index: 1, kind: input, shape index: {}]   ;;  %s1962_s2 = inlined_call_operand.hbm [shape: f32[2,4,256], index: 2, kind: output, shape index: {}]  }
   0x1   :  { %1972 = sst [smem:[#allocation15_spill]] %s1962_s2 }
   0x2   :  { %7 = vsyncpa [#allocation4], 0 }
   0x3   :  { %9 = vsyncpa [#allocation4 + $0x1], 0 }
   0x4   :  { %10 = vsyncpa [#allocation7], 0 }
   0x5   :  { %12 = vsyncpa [#allocation7 + $0x1], 0 }
   0x6   :  { %13 = vsyncpa [#allocation5], 0 }
   0x7   :  { %15 = vsyncpa [#allocation5 + $0x1], 0  ;;  %s1243_s9 = smov 0   ;;  %s1245_s10 = smov 0  }
   0x8   :  { %s1247_s11 = smov 0   ;;  %s1249_s12 = smov 0  }
   0x9   :  { %s1251_s13 = smov 0   ;;  %s1253_s14 = smov 0  }
   0xa   :  { %s1255_s15 = smov 0   ;;  %s1257_s16 = smov 0  }
   0xb   :  { %s1259_s17 = smov 0   ;;  %s1261_s18 = smov 0  }
   0xc   :  { %s1263_s19 = smov 0  }
   0xd LB: > { %1973 = sst [smem:[#allocation12_spill]] %s1194_s12  ;;  %s876_s20 = sadd.s32 4294967295, %s1222_s19   ;;  %s1222_s19 = sphi %s1263_s19, %s21_s19   ;;  %s1218_s18 = sphi %s1261_s18, %s2015_s18   ;;  %s1214_s17 = sphi %s1259_s17, %s2014_s17   ;;  %s1210_s16 = sphi %s1257_s16, %s2013_s16   ;;  %s1206_s15 = sphi %s1255_s15, %s2012_s15   ;;  %s1202_s14 = sphi %s1253_s14, %s2011_s14   ;;  %s1198_s13 = sphi %s1251_s13, %s2010_s13   ;;  %s1194_s12 = sphi %s1249_s12, %s2009_s12   ;;  %s1190_s11 = sphi %s1247_s11, %s2008_s11   ;;  %s1186_s10 = sphi %s1245_s10, %s2007_s10   ;;  %s1182_s9 = sphi %s1243_s9, %s2006_s9  }
   0xe   : > { %s877_s21 = sadd.s32 4294967294, %s1222_s19   ;;  %s36_s22 = sadd.s32 1, %s1214_s17 }
   0xf   : > { %s40_s23 = sadd.s32 1, %s1218_s18  ;;  %p38_p0 = scmp.ge.s32.totalorder %s36_s22, 2 }
  0x10   : > { %s49_s24 = sadd.s32 1, %s1202_s14  ;;  %p56_p1 = scmp.ne.s32.totalorder %s1202_s14, %s1198_s13 }
  0x11   : > { %p1967_p2 = scmp.eq.s32.totalorder %s1222_s19, 0  ;;  %s2017_s22 = smov (%p38_p0, %s36_s22), 0 }
  0x12   : > { %1974 = sst [smem:[#allocation13_spill]] %s2017_s22  ;;  %s2019_s23 = smov (!%p38_p0, %s40_s23), %s1218_s18 }
  0x13   : > { %s45_s25 = ssub.s32 %s1214_s17, %s2017_s22  ;;  %p1313_p3 = por %p1967_p2, %p56_p1 }
  0x14   : > { %p42_p4 = scmp.ge.s32.totalorder %s2019_s23, 2  ;;  %p62_p5 = scmp.ne.s32.totalorder %s1198_s13, %s1194_s12 }
  0x15   : > { %p1319_p6 = scmp.eq.s32.totalorder %s876_s20, 0  ;;  %p116_p7 = scmp.eq.s32.totalorder %s876_s20, 3 }
  0x16   : > { %s2021_s23 = smov (%p42_p4, %s2019_s23), 0  ;;  %p122_p10 = scmp.eq.s32.totalorder %s877_s21, 3 }
  0x17   : > { %1977 = sst [smem:[#allocation14_spill]] %s2021_s23  ;;  %p1327_p8 = por %p1319_p6, %p62_p5 }
  0x18   : > { %p1331_p9 = por %p116_p7, %p56_p1  ;;  %s1337_s30 = ssub.s32 %s1218_s18, %s2021_s23 }
  0x19   : > { %s1978_s28 = scalar_select %p1327_p8, 1, 0 }
  0x1a   : > { %s1979_s29 = scalar_select %p1331_p9, 1, 0 }
  0x1b   : > { %s46_s3 = sor.u32 %s45_s25, %s1337_s30  ;;  %p1341_p13 = por %p122_p10, %p62_p5 }
  0x1c   : > { %p47_p12 = scmp.eq.s32.totalorder %s46_s3, 0  ;;  %p1968_p0 = scmp.lt.s32.totalorder %s1222_s19, 4 }
  0x1d   : > { %s1980_s4 = scalar_select %p1341_p13, 1, 0 }
  0x1e   : > { %s1347_s5 = scalar_select %p47_p12, %s1202_s14, %s49_s24  }
  0x1f   : > { %s142_s6 = sand.u32 1, %s1202_s14   ;;  %s881_s7 = sshll.u32 %s1218_s18, 1 }
  0x20   : > { %s880_s8 = sshll.u32 %s142_s6, 1  ;;  %s151_s20 = sadd.s32 %s1214_s17, %s881_s7 }
  0x21   : > { %s882_s23 = sshll.u32 %s151_s20, 5  ;;  %s146_s21 = scalar_lea.vmem [#allocation3], %s880_s8 }
  0x22   : > { %s155_s22 = sshll.u32 %s146_s21, 4  ;;  %s1355_s2 = scalar_lea.hbm %s1960_s0, %s882_s23  ;;  %s1357_s22 = int_to_ptr.vmem [resolvable:$true] %s155_s22 }
  0x23   : > { %p1363_p1 = pnand %p1968_p0, %p1313_p3  ;;  %s143_s3 = scalar_lea.sflag [#allocation4], %s142_s6 }
  0x24   : > { %s1036_s12 = scalar_lea.hbm %s1355_s2, 32  ;;  %s1041_s7 = scalar_lea.hbm %s1960_s0, 128 }
  0x25   : > { %p1037_p7 = scmp.ne.s32.totalorder %s1355_s2, %s1036_s12  ;;  %p1038_p10 = pneg %p1363_p1 }
  0x26   : > { %p1042_p3 = scmp.lt.u32.totalorder %s1355_s2, %s1960_s0  ;;  %p1043_p0 = scmp.lt.u32.totalorder %s1041_s7, %s1036_s12 }
  0x27   : > { %p1039_p12 = pnand %p1038_p10, %p1037_p7  ;;  %p1045_p4 = scmp.lt.u32.totalorder %s1036_s12, %s1355_s2 }
  0x28   : > { %p1044_p11 = por %p1043_p0, %p1042_p3 }
  0x29   : > { %p1040_p2 = pneg %p1039_p12 }
  0x2a   : > { %p1046_p5 = por %p1045_p4, %p1044_p11 }
  0x2c   : > { %p1047_p13 = pnand %p1046_p5, %p1040_p2 }
  0x2e   : > { %1050 = shalt.err (!%p1047_p13)
}
  0x2f   : > { %s1051_s6 = scalar_lea.vmem %s1357_s22, 32  ;;  %s1224_s21 = smov [#allocation3]  }
  0x30   : > { %p1052_p7 = scmp.ne.s32.totalorder %s1357_s22, %s1051_s6  ;;  %s1056_s25 = sshll.u32 %s1224_s21, 4  ;;  %s1057_s25 = int_to_ptr.vmem [resolvable:$false] %s1056_s25 }
  0x31   : > { %s1058_s23 = scalar_lea.vmem %s1057_s25, 64  ;;  %p1059_p8 = scmp.lt.s32.totalorder %s1357_s22, %s1057_s25 }
  0x32   : > { %p1054_p12 = pnand %p1052_p7, %p1038_p10  ;;  %p1060_p0 = scmp.lt.s32.totalorder %s1058_s23, %s1051_s6 }
  0x34   : > { %p1055_p9 = pneg %p1054_p12  ;;  %p1061_p3 = por %p1060_p0, %p1059_p8 }
  0x36   : > { %p1062_p11 = pnand %p1061_p3, %p1055_p9 }
  0x38   : > { %1065 = shalt.err (!%p1062_p11)
}
  0x39   : > { %937 = dma.hbm_to_vmem [thread:$0]  (!%p1363_p1), %s1355_s2, 32, %s1357_s22, %s143_s3  }
  0x3a   : > { %p1982_p2 = scmp.lt.s32.totalorder %s1222_s19, 5  ;;  %p1983_p8 = scmp.ge.s32.totalorder %s1222_s19, 1 }
  0x3b   : > { %s77_s12 = sadd.s32 1, %s1190_s11  ;;  %p1985_p13 = scmp.eq.s32.totalorder %s1337_s30, 0 }
  0x3c   : > { %p1398_p9 = pnand %p1983_p8, %p1982_p2  ;;  %p84_p4 = scmp.ne.s32.totalorder %s1190_s11, %s1186_s10 }
  0x3d   : > { %s1406_s26 = scalar_select %p1985_p13, %s1190_s11, %s77_s12  }
  0x3e   : > { %p90_p5 = scmp.ne.s32.totalorder %s1186_s10, %s1182_s9  ;;  %s162_s7 = sand.u32 1, %s1190_s11  }
  0x3f   : > { %s901_s8 = sshll.u32 %s1218_s18, 6  ;;  %p1986_p10 = scmp.eq.s32.totalorder %s1222_s19, 0 }
  0x40   : > { %p1418_p12 = por %p90_p5, %p1319_p6  ;;  %s883_s2 = sshll.u32 %s162_s7, 2 }
  0x41   : > { %p86_p7 = por %p84_p4, %p1986_p10  ;;  %s1425_s6 = scalar_lea.hbm %s1961_s1, %s901_s8 }
  0x42   : > { %s1987_s20 = scalar_select %p1418_p12, 1, 0 }
  0x43   : > { %s166_s9 = scalar_lea.vmem [#allocation6], %s883_s2  ;;  %p1988_p1 = scmp.lt.s32.totalorder %s1222_s19, 4 }
  0x44   : > { %s176_s30 = sshll.u32 %s166_s9, 4  ;;  %s163_s27 = scalar_lea.sflag [#allocation7], %s162_s7  ;;  %s1433_s30 = int_to_ptr.vmem [resolvable:$true] %s176_s30 }
  0x45   : > { %p1429_p0 = pnand %p1988_p1, %p86_p7  ;;  %s1066_s25 = scalar_lea.hbm %s1425_s6, 64 }
  0x46   : > { %p1067_p6 = scmp.ne.s32.totalorder %s1425_s6, %s1066_s25  ;;  %s1071_s8 = scalar_lea.hbm %s1961_s1, 128 }
  0x47   : > { %p1068_p3 = pneg %p1429_p0  ;;  %p1072_p8 = scmp.lt.u32.totalorder %s1425_s6, %s1961_s1 }
  0x48   : > { %p1073_p13 = scmp.lt.u32.totalorder %s1071_s8, %s1066_s25  ;;  %p1075_p5 = scmp.lt.u32.totalorder %s1066_s25, %s1425_s6 }
  0x49   : > { %p1069_p11 = pnand %p1068_p3, %p1067_p6 }
  0x4a   : > { %p1074_p4 = por %p1073_p13, %p1072_p8 }
  0x4b   : > { %p1070_p2 = pneg %p1069_p11 }
  0x4c   : > { %p1076_p10 = por %p1075_p5, %p1074_p4 }
  0x4e   : > { %p1077_p7 = pnand %p1076_p10, %p1070_p2 }
  0x50   : > { %1080 = shalt.err (!%p1077_p7)
}
  0x51   : > { %s1081_s7 = scalar_lea.vmem %s1433_s30, 64  ;;  %s1225_s3 = smov [#allocation6]  }
  0x52   : > { %p1082_p1 = scmp.ne.s32.totalorder %s1433_s30, %s1081_s7  ;;  %s1086_s9 = sshll.u32 %s1225_s3, 4  ;;  %s1087_s9 = int_to_ptr.vmem [resolvable:$false] %s1086_s9 }
  0x53   : > { %s1088_s23 = scalar_lea.vmem %s1087_s9, 128  ;;  %p1089_p12 = scmp.lt.s32.totalorder %s1433_s30, %s1087_s9 }
  0x54   : > { %p1084_p6 = pnand %p1082_p1, %p1068_p3  ;;  %p1090_p8 = scmp.lt.s32.totalorder %s1088_s23, %s1081_s7 }
  0x56   : > { %p1085_p11 = pneg %p1084_p6  ;;  %p1091_p13 = por %p1090_p8, %p1089_p12 }
  0x58   : > { %p1092_p4 = pnand %p1091_p13, %p1085_p11 }
  0x5a   : > { %1095 = shalt.err (!%p1092_p4)
}
  0x5b   : > { %940 = dma.hbm_to_vmem [thread:$0]  (!%p1429_p0), %s1425_s6, 64, %s1433_s30, %s163_s27  }
  0x5c   : > { %185 = sbr.rel (%p1398_p9) target bundleno = 460 (0x1cc), region = 28  ;;  %s1463_s25 = sand.u32 (!%p1398_p9), 1, %s1198_s13  }
  0x5d   : > { %s887_s12 = sshll.u32 (!%p1398_p9), %s1463_s25, 1  ;;  %s188_s8 = scalar_lea.sflag (!%p1398_p9), [#allocation4], %s1463_s25 }
  0x5e   : > { %s191_s2 = scalar_lea.vmem (!%p1398_p9), [#allocation3], %s887_s12  ;;  %p1990_p12 = scmp.ne.s32.totalorder (!%p1398_p9), %s1978_s28, 0 }
  0x63   : > { %1169 = dma.done.wait (%p1990_p12), %s188_s8, 32  }
  0x64   : > { %1171 = vsyncadd (%p1990_p12), %s188_s8, 4294967264  ;;  %s196_s6 = sand.u32 1, %s1186_s10   ;;  %p1991_p9 = scmp.ne.s32.totalorder %s1987_s20, 0 }
  0x65   : > { %s888_s30 = sshll.u32 %s196_s6, 2  ;;  %s197_s24 = scalar_lea.sflag [#allocation7], %s196_s6 }
  0x66   : > { %s200_s21 = scalar_lea.vmem [#allocation6], %s888_s30 }
  0x67   : > { %1173 = dma.done.wait (%p1991_p9), %s197_s24, 64  }
  0x68   : > { %1175 = vsyncadd (%p1991_p9), %s197_s24, 4294967232  ;;  %v233_v0 = vlaneseq  ;;  %s890_s27 = sshll.u32 %s1206_s15, 7  ;;  %v1226_v2 = vmov 0.0   ;;  %v245_v8 = vld [vmem:[%s191_s2] sm:$0x1]  ;;  %s889_s28 = sshll.u32 %s1463_s25, 2 }
  0x69   : > { %v236_v1 = vstv %s890_s27  ;;  %232 = vst [vmem:[#allocation2] sm:$0xf] %v1226_v2  ;;  %v1480_v13 = vld.sshfl [vmem:[%s200_s21] sm:$0x33 pattern:$0x76325410] }
  0x6a   : > { %v234_v3 = vand.u32 127, %v233_v0  ;;  %v1478_v9 = vshrl.u32 %v233_v0, 7  ;;  %v247_v14 = vld [vmem:[%s191_s2 + $0x1] sm:$0x1]  ;;  %v696_v17 = vcombine.high %v1480_v13, %v1480_v13  ;;  %s897_s20 = sshll.u32 %s1210_s16, 1  ;;  %s225_s3 = scalar_lea.vmem [#allocation8], %s889_s28 }
  0x6b   : > { %s758_s22 = sadd.s32 %s1206_s15, %s897_s20  ;;  %s762_s9 = sshll.u32 %s225_s3, 4  ;;  %s1899_s9 = int_to_ptr.vmem [resolvable:$true] %s762_s9 }
  0x6c   : > { %v237_v4 = vadd.s32 %v236_v1, %v234_v3  ;;  %v1483_v15 = vsub.s32 0, %v1478_v9  ;;  %v1486_v16 = vadd.s32 128, %v1478_v9  ;;  %v1491_v20 = vadd.s32 136, %v1478_v9  ;;  %731 = vmatprep.mubr.bf16.mxu0 %v696_v17  ;;  %s898_s7 = sshll.u32 %s758_s22, 6  ;;  %s2000_s8 = sld [smem:[#allocation15_spill]] }
  0x6d   : > { %v1494_v21 = vadd.s32 8, %v1478_v9  ;;  %v1497_v22 = vadd.s32 144, %v1478_v9  ;;  %v1500_v23 = vadd.s32 152, %v1478_v9  ;;  %v1503_v24 = vadd.s32 16, %v1478_v9  ;;  %s747_s6 = scalar_lea.sflag [#allocation5], %s1463_s25  ;;  %s1096_s16 = scalar_lea.vmem %s1899_s9, 64 }
  0x6e   : > { %v238_v5 = vcvt.s32.f32 %v237_v4  ;;  %v1506_v25 = vadd.s32 24, %v1478_v9  ;;  %v1509_v29 = vadd.s32 160, %v1478_v9  ;;  %v1512_v30 = vadd.s32 168, %v1478_v9  ;;  %p1097_p0 = scmp.ne.s32.totalorder %s1899_s9, %s1096_s16  ;;  %p2001_p3 = scmp.ne.s32.totalorder %s1979_s29, 0 }
  0x6f   : > { %v1515_v31 = vadd.s32 32, %v1478_v9  ;;  %v1518_v32 = vadd.s32 40, %v1478_v9  ;;  %v1521_v33 = vadd.s32 176, %v1478_v9  ;;  %v1524_v36 = vadd.s32 184, %v1478_v9  ;;  %s1227_s15 = smov [#allocation8]  }
  0x70   : > { %v239_v6 = vadd.f32 0.5, %v238_v5  ;;  %v1527_v37 = vadd.s32 48, %v1478_v9  ;;  %v1530_v39 = vadd.s32 56, %v1478_v9  ;;  %v1533_v40 = vadd.s32 192, %v1478_v9  ;;  %p1098_p2 = pnand %p1097_p0, %p2001_p3  ;;  %s1100_s30 = sshll.u32 %s1227_s15, 4  ;;  %s1101_s30 = int_to_ptr.vmem [resolvable:$false] %s1100_s30 }
  0x71   : > { %v1536_v41 = vadd.s32 200, %v1478_v9  ;;  %v1539_v46 = vadd.s32 64, %v1478_v9  ;;  %v1542_v47 = vadd.s32 72, %v1478_v9  ;;  %v1549_v51 = vadd.s32 208, %v1478_v9  ;;  %s1102_s24 = scalar_lea.vmem %s1101_s30, 128  ;;  %p1103_p10 = scmp.lt.s32.totalorder %s1899_s9, %s1101_s30 }
  0x72   : > { %v241_v7 = vmul.f32 0.0625, %v239_v6  ;;  %v1552_v52 = vadd.s32 216, %v1478_v9  ;;  %v1555_v53 = vadd.s32 80, %v1478_v9  ;;  %v1558_v54 = vadd.s32 88, %v1478_v9  ;;  %s1897_s2 = scalar_lea.hbm %s2000_s8, %s898_s7  ;;  %p1099_p5 = pneg %p1098_p2 }
  0x73   : > { %v1565_v58 = vadd.s32 224, %v1478_v9  ;;  %v1571_v60 = vadd.s32 232, %v1478_v9  ;;  %v1574_v61 = vadd.s32 96, %v1478_v9  ;;  %v1578_v63 = vadd.s32 104, %v1478_v9  ;;  %p1104_p7 = scmp.lt.s32.totalorder %s1102_s24, %s1096_s16 }
  0x74   : > { %v242_v10 = vfloor.f32 %v241_v7  ;;  %v1581_v0 = vadd.s32 240, %v1478_v9  ;;  %v1591_v4 = vadd.s32 248, %v1478_v9 }
  0x75   : > { %p1105_p1 = por %p1104_p7, %p1103_p10 }
  0x76   : > { %v243_v11 = vmul.f32 16.0, %v242_v10  ;;  %v246_v12 = vadd.f32 %v245_v8, %v242_v10  ;;  %v1595_v8 = vadd.s32 112, %v1478_v9 }
  0x77   : > { %p1106_p6 = pnand %p1105_p1, %p1099_p5 }
  0x78   : > { %v244_v18 = vsub.f32 %v238_v5, %v243_v11  ;;  %v249_v19 = vfloor.f32 %v246_v12 }
  0x7a   : > { %v248_v26 = vadd.f32 %v247_v14, %v244_v18  ;;  %v251_v27 = vsub.f32 %v246_v12, %v249_v19  ;;  %v924_v28 = vtrunc.f32 %v249_v19 }
  0x7c   : > { %v250_v34 = vfloor.f32 %v248_v26  ;;  %v925_v35 = vcvt.f32.s32 %v924_v28  ;;  %v252_v38 = vsub.f32 1.0, %v251_v27 }
  0x7e   : > { %v253_v42 = vsub.f32 %v248_v26, %v250_v34  ;;  %v926_v43 = vtrunc.f32 %v250_v34  ;;  %vm258_vm0 = vcmp.ge.s32.totalorder %v925_v35, 0  ;;  %vm259_vm1 = vcmp.le.s32.totalorder %v925_v35, 15 }
  0x7f   : > { %v278_v44 = vadd.s32 1, %v925_v35  ;;  %v293_v45 = vmul.u32 16, %v925_v35  ;;  %vm1544_vm2 = vmand %vm258_vm0, %vm259_vm1 }
  0x80   : > { %v254_v48 = vsub.f32 1.0, %v253_v42  ;;  %v927_v49 = vcvt.f32.s32 %v926_v43  ;;  %v268_v62 = vmul.f32 %v253_v42, %v252_v38  ;;  %v287_v7 = vmul.f32 %v253_v42, %v251_v27 }
  0x81   : > { %vm279_vm3 = vcmp.ge.s32.totalorder %v278_v44, 0  ;;  %vm280_vm4 = vcmp.le.s32.totalorder %v278_v44, 15 }
  0x82   : > { %v257_v55 = vmul.f32 %v254_v48, %v252_v38  ;;  %vm261_vm5 = vcmp.ge.s32.totalorder %v927_v49, 0  ;;  %v269_v56 = vadd.s32 1, %v927_v49  ;;  %vm1560_vm6 = vmand %vm279_vm3, %vm280_vm4  ;;  %vm263_vm8 = vcmp.le.s32.totalorder %v927_v49, 15 }
  0x83   : > { %vm262_vm7 = vmand %vm1544_vm2, %vm261_vm5  ;;  %v294_v59 = vadd.s32 %v927_v49, %v293_v45  ;;  %v277_v6 = vmul.f32 %v254_v48, %v251_v27 }
  0x84   : > { %vm264_vm9 = vmand %vm262_vm7, %vm263_vm8  ;;  %vm270_vm10 = vcmp.ge.s32.totalorder %v269_v56, 0  ;;  %vm272_vm12 = vcmp.le.s32.totalorder %v269_v56, 15 }
  0x85   : > { %v891_v1 = vsel %vm264_vm9, 1.0, %v1226_v2  ;;  %vm271_vm11 = vmand %vm1544_vm2, %vm270_vm10  ;;  %v1588_v3 = vrot.slane %v294_v59, %v1483_v15 }
  0x86   : > { %v267_v5 = vmul.f32 %v891_v1, %v257_v55  ;;  %vm273_vm13 = vmand %vm271_vm11, %vm272_vm12 }
  0x87   : > { %v892_v10 = vsel %vm273_vm13, 1.0, %v1226_v2  ;;  %vm282_vm14 = vmand %vm1560_vm6, %vm261_vm5  ;;  %v382_v11 = vsub.s32 %v1486_v16, %v1588_v3  ;;  %v383_v12 = vsub.s32 %v1491_v20, %v1588_v3  ;;  %v366_v14 = vsub.s32 %v1478_v9, %v1588_v3 }
  0x88   : > { %v276_v17 = vmul.f32 %v892_v10, %v268_v62  ;;  %vm283_vm15 = vmand %vm282_vm14, %vm263_vm8  ;;  %v1609_v18 = vrot.slane %v267_v5, %v1483_v15  ;;  %v367_v19 = vsub.s32 %v1494_v21, %v1588_v3  ;;  %v1615_v26 = vsub.s32 %v1497_v22, %v1588_v3 }
  0x89   : > { %v893_v16 = vsel %vm283_vm15, 1.0, %v1226_v2  ;;  %vm288_vm0 = vmand %vm1560_vm6, %vm270_vm10  ;;  %vm446_vm3 = vcmp.eq.s32.totalorder %v382_v11, 1  ;;  %vm478_vm7 = vcmp.eq.s32.totalorder %v382_v11, 16  ;;  %vm479_vm8 = vcmp.eq.s32.totalorder %v383_v12, 16 }
  0x8a   : > { %v286_v20 = vmul.f32 %v893_v16, %v277_v6  ;;  %vm289_vm4 = vmand %vm288_vm0, %vm272_vm12  ;;  %v1623_v27 = vrot.slane %v276_v17, %v1483_v15  ;;  %vm510_vm9 = vcmp.eq.s32.totalorder %v382_v11, 17  ;;  %vm511_vm11 = vcmp.eq.s32.totalorder %v383_v12, 17 }
  0x8b   : > { %v894_v21 = vsel %vm289_vm4, 1.0, %v1226_v2  ;;  %vm398_vm6 = vcmp.eq.s32.totalorder %v366_v14, 0  ;;  %vm430_vm13 = vcmp.eq.s32.totalorder %v366_v14, 1  ;;  %vm431_vm14 = vcmp.eq.s32.totalorder %v367_v19, 1 }
  0x8c   : > { %v292_v22 = vmul.f32 %v894_v21, %v287_v7  ;;  %v1627_v28 = vrot.slane %v286_v20, %v1483_v15  ;;  %vm462_vm15 = vcmp.eq.s32.totalorder %v366_v14, 16  ;;  %vm463_vm12 = vcmp.eq.s32.totalorder %v367_v19, 16 }
  0x8d   : > { %vm494_vm0 = vcmp.eq.s32.totalorder %v366_v14, 17  ;;  %vm495_vm2 = vcmp.eq.s32.totalorder %v367_v19, 17  ;;  %v385_v2 = vsub.s32 %v1500_v23, %v1588_v3  ;;  %vm416_vm4 = vcmp.eq.s32.totalorder %v1615_v26, 0 }
  0x8e   : > { %v1630_v34 = vrot.slane %v292_v22, %v1483_v15  ;;  %vm448_vm1 = vcmp.eq.s32.totalorder %v1615_v26, 1  ;;  %vm480_vm5 = vcmp.eq.s32.totalorder %v1615_v26, 16  ;;  %vm512_vm10 = vcmp.eq.s32.totalorder %v1615_v26, 17 }
  0x8f   : > { %v368_v7 = vsub.s32 %v1503_v24, %v1588_v3  ;;  %v386_v14 = vsub.s32 %v1509_v29, %v1588_v3  ;;  %v387_v21 = vsub.s32 %v1512_v30, %v1588_v3 }
  0x90   : > { %v546_v35 = vsel %vm510_vm9, %v1630_v34, 0.0  ;;  %v547_v15 = vsel %vm511_vm11, %v1630_v34, 0.0  ;;  %v530_v38 = vsel %vm494_vm0, %v1630_v34, 0.0  ;;  %v531_v42 = vsel %vm495_vm2, %v1630_v34, 0.0 }
  0x91   : > { %v582_v23 = vsel %vm478_vm7, %v1627_v28, %v546_v35  ;;  %v583_v43 = vsel %vm479_vm8, %v1627_v28, %v547_v15  ;;  %v566_v44 = vsel %vm462_vm15, %v1627_v28, %v530_v38  ;;  %v567_v45 = vsel %vm463_vm12, %v1627_v28, %v531_v42 }
  0x92   : > { %v618_v48 = vsel %vm446_vm3, %v1623_v27, %v582_v23  ;;  %vm1996_vm9 = vcmp.eq.s32.totalorder %v383_v12, 1  ;;  %v602_v50 = vsel %vm430_vm13, %v1623_v27, %v566_v44  ;;  %v603_v55 = vsel %vm431_vm14, %v1623_v27, %v567_v45 }
  0x93   : > { %v619_v49 = vsel %vm1996_vm9, %v1623_v27, %v583_v43  ;;  %vm1997_vm2 = vcmp.eq.s32.totalorder %v382_v11, 0  ;;  %vm1998_vm7 = vcmp.eq.s32.totalorder %v383_v12, 0  ;;  %v638_v59 = vsel %vm398_vm6, %v1609_v18, %v602_v50 }
  0x94   : > { %v654_v56 = vsel %vm1997_vm2, %v1609_v18, %v618_v48  ;;  %v655_v57 = vsel %vm1998_vm7, %v1609_v18, %v619_v49  ;;  %vm1999_vm3 = vcmp.eq.s32.totalorder %v367_v19, 0  ;;  %vm417_vm8 = vcmp.eq.s32.totalorder %v385_v2, 0 }
  0x95   : > { %v639_v62 = vsel %vm1999_vm3, %v1609_v18, %v603_v55  ;;  %v678_v1 = vpack.c.bf16 %v655_v57, %v654_v56  ;;  %vm449_vm11 = vcmp.eq.s32.totalorder %v385_v2, 1  ;;  %vm481_vm13 = vcmp.eq.s32.totalorder %v385_v2, 16 }
  0x96   : > { %v670_v5 = vpack.c.bf16 %v639_v62, %v638_v59  ;;  %vm513_vm15 = vcmp.eq.s32.totalorder %v385_v2, 17  ;;  %v548_v6 = vsel %vm512_vm10, %v1630_v34, 0.0  ;;  %v369_v12 = vsub.s32 %v1506_v25, %v1588_v3 }
  0x97   : > { %902 = vmatprep.subr.bf16.mxu0 %v678_v1  ;;  %v549_v10 = vsel %vm513_vm15, %v1630_v34, 0.0  ;;  %v584_v11 = vsel %vm480_vm5, %v1627_v28, %v548_v6  ;;  %vm400_vm6 = vcmp.eq.s32.totalorder %v368_v7, 0  ;;  %vm432_vm10 = vcmp.eq.s32.totalorder %v368_v7, 1 }
  0x98   : > { %903 = vmatpush3.bf16.msra.mxu0 %v670_v5  ;;  %v585_v17 = vsel %vm481_vm13, %v1627_v28, %v549_v10  ;;  %v620_v24 = vsel %vm448_vm1, %v1623_v27, %v584_v11  ;;  %vm401_vm5 = vcmp.eq.s32.totalorder %v369_v12, 0  ;;  %vm433_vm14 = vcmp.eq.s32.totalorder %v369_v12, 1 }
  0x99   : > { %v621_v19 = vsel %vm449_vm11, %v1623_v27, %v585_v17  ;;  %v656_v16 = vsel %vm416_vm4, %v1609_v18, %v620_v24  ;;  %vm464_vm12 = vcmp.eq.s32.totalorder %v368_v7, 16  ;;  %vm465_vm0 = vcmp.eq.s32.totalorder %v369_v12, 16 }
  0x9a   : > { %v657_v25 = vsel %vm417_vm8, %v1609_v18, %v621_v19  ;;  %vm496_vm9 = vcmp.eq.s32.totalorder %v368_v7, 17  ;;  %vm497_vm2 = vcmp.eq.s32.totalorder %v369_v12, 17  ;;  %vm418_vm1 = vcmp.eq.s32.totalorder %v386_v14, 0 }
  0x9b   : > { %v679_v29 = vpack.c.bf16 %v657_v25, %v656_v16  ;;  %v532_v20 = vsel %vm496_vm9, %v1630_v34, 0.0  ;;  %v533_v22 = vsel %vm497_vm2, %v1630_v34, 0.0  ;;  %vm450_vm4 = vcmp.eq.s32.totalorder %v386_v14, 1 }
  0x9c   : > { %v568_v26 = vsel %vm464_vm12, %v1627_v28, %v532_v20  ;;  %v569_v2 = vsel %vm465_vm0, %v1627_v28, %v533_v22  ;;  %vm419_vm7 = vcmp.eq.s32.totalorder %v387_v21, 0  ;;  %vm451_vm3 = vcmp.eq.s32.totalorder %v387_v21, 1 }
  0x9d   : > { %904 = vmatprep.subr.bf16.mxu0 %v679_v29  ;;  %v604_v35 = vsel %vm432_vm10, %v1623_v27, %v568_v26  ;;  %v605_v15 = vsel %vm433_vm14, %v1623_v27, %v569_v2  ;;  %vm482_vm8 = vcmp.eq.s32.totalorder %v386_v14, 16  ;;  %vm483_vm11 = vcmp.eq.s32.totalorder %v387_v21, 16 }
  0x9e   : > { %v640_v30 = vsel %vm400_vm6, %v1609_v18, %v604_v35  ;;  %v641_v38 = vsel %vm401_vm5, %v1609_v18, %v605_v15  ;;  %vm514_vm13 = vcmp.eq.s32.totalorder %v386_v14, 17  ;;  %vm515_vm15 = vcmp.eq.s32.totalorder %v387_v21, 17 }
  0x9f   : > { %v370_v42 = vsub.s32 %v1515_v31, %v1588_v3  ;;  %v671_v23 = vpack.c.bf16 %v641_v38, %v640_v30  ;;  %v550_v43 = vsel %vm514_vm13, %v1630_v34, 0.0  ;;  %v551_v44 = vsel %vm515_vm15, %v1630_v34, 0.0 }
  0xa0   : > { %v371_v45 = vsub.s32 %v1518_v32, %v1588_v3  ;;  %v586_v48 = vsel %vm482_vm8, %v1627_v28, %v550_v43  ;;  %v587_v49 = vsel %vm483_vm11, %v1627_v28, %v551_v44  ;;  %v388_v57 = vsub.s32 %v1521_v33, %v1588_v3 }
  0xa1   : > { %vm402_vm6 = vcmp.eq.s32.totalorder %v370_v42, 0  ;;  %vm434_vm10 = vcmp.eq.s32.totalorder %v370_v42, 1  ;;  %905 = vmatpush3.bf16.msra.mxu0 %v671_v23  ;;  %v622_v50 = vsel %vm450_vm4, %v1623_v27, %v586_v48  ;;  %v623_v31 = vsel %vm451_vm3, %v1623_v27, %v587_v49 }
  0xa2   : > { %vm403_vm5 = vcmp.eq.s32.totalorder %v371_v45, 0  ;;  %vm435_vm14 = vcmp.eq.s32.totalorder %v371_v45, 1  ;;  %v658_v55 = vsel %vm418_vm1, %v1609_v18, %v622_v50  ;;  %v659_v32 = vsel %vm419_vm7, %v1609_v18, %v623_v31 }
  0xa3   : > { %vm466_vm12 = vcmp.eq.s32.totalorder %v370_v42, 16  ;;  %vm467_vm0 = vcmp.eq.s32.totalorder %v371_v45, 16  ;;  %v680_v56 = vpack.c.bf16 %v659_v32, %v658_v55  ;;  %vm498_vm9 = vcmp.eq.s32.totalorder %v370_v42, 17 }
  0xa4   : > { %vm499_vm2 = vcmp.eq.s32.totalorder %v371_v45, 17  ;;  %v534_v59 = vsel %vm498_vm9, %v1630_v34, 0.0  ;;  %v389_v1 = vsub.s32 %v1524_v36, %v1588_v3  ;;  %v372_v5 = vsub.s32 %v1527_v37, %v1588_v3 }
  0xa5   : > { %v535_v62 = vsel %vm499_vm2, %v1630_v34, 0.0  ;;  %906 = vmatprep.subr.bf16.mxu0 %v680_v56  ;;  %v570_v6 = vsel %vm466_vm12, %v1627_v28, %v534_v59  ;;  %vm420_vm1 = vcmp.eq.s32.totalorder %v388_v57, 0  ;;  %vm452_vm4 = vcmp.eq.s32.totalorder %v388_v57, 1 }
  0xa6   : > { %v571_v7 = vsel %vm467_vm0, %v1627_v28, %v535_v62  ;;  %v606_v33 = vsel %vm434_vm10, %v1623_v27, %v570_v6  ;;  %vm421_vm7 = vcmp.eq.s32.totalorder %v389_v1, 0  ;;  %vm453_vm3 = vcmp.eq.s32.totalorder %v389_v1, 1 }
  0xa7   : > { %v607_v10 = vsel %vm435_vm14, %v1623_v27, %v571_v7  ;;  %v642_v36 = vsel %vm402_vm6, %v1609_v18, %v606_v33  ;;  %vm484_vm8 = vcmp.eq.s32.totalorder %v388_v57, 16  ;;  %vm485_vm11 = vcmp.eq.s32.totalorder %v389_v1, 16 }
  0xa8   : > { %v643_v37 = vsel %vm403_vm5, %v1609_v18, %v607_v10  ;;  %vm516_vm13 = vcmp.eq.s32.totalorder %v388_v57, 17  ;;  %vm517_vm15 = vcmp.eq.s32.totalorder %v389_v1, 17  ;;  %v373_v12 = vsub.s32 %v1530_v39, %v1588_v3 }
  0xa9   : > { %v672_v11 = vpack.c.bf16 %v643_v37, %v642_v36  ;;  %v552_v14 = vsel %vm516_vm13, %v1630_v34, 0.0  ;;  %v553_v17 = vsel %vm517_vm15, %v1630_v34, 0.0  ;;  %vm404_vm10 = vcmp.eq.s32.totalorder %v372_v5, 0 }
  0xaa   : > { %vm436_vm14 = vcmp.eq.s32.totalorder %v372_v5, 1  ;;  %v588_v24 = vsel %vm484_vm8, %v1627_v28, %v552_v14  ;;  %v589_v19 = vsel %vm485_vm11, %v1627_v28, %v553_v17  ;;  %vm405_vm6 = vcmp.eq.s32.totalorder %v373_v12, 0 }
  0xab   : > { %907 = vmatpush3.bf16.msra.mxu0 %v672_v11  ;;  %vm437_vm5 = vcmp.eq.s32.totalorder %v373_v12, 1  ;;  %v624_v16 = vsel %vm452_vm4, %v1623_v27, %v588_v24  ;;  %v625_v25 = vsel %vm453_vm3, %v1623_v27, %v589_v19  ;;  %vm468_vm12 = vcmp.eq.s32.totalorder %v372_v5, 16 }
  0xac   : > { %vm469_vm0 = vcmp.eq.s32.totalorder %v373_v12, 16  ;;  %v660_v39 = vsel %vm420_vm1, %v1609_v18, %v624_v16  ;;  %v661_v29 = vsel %vm421_vm7, %v1609_v18, %v625_v25  ;;  %vm500_vm9 = vcmp.eq.s32.totalorder %v372_v5, 17 }
  0xad   : > { %vm501_vm2 = vcmp.eq.s32.totalorder %v373_v12, 17  ;;  %v681_v20 = vpack.c.bf16 %v661_v29, %v660_v39  ;;  %v536_v21 = vsel %vm500_vm9, %v1630_v34, 0.0  ;;  %v390_v26 = vsub.s32 %v1533_v40, %v1588_v3 }
  0xae   : > { %v537_v22 = vsel %vm501_vm2, %v1630_v34, 0.0  ;;  %v572_v2 = vsel %vm468_vm12, %v1627_v28, %v536_v21  ;;  %v391_v15 = vsub.s32 %v1536_v41, %v1588_v3  ;;  %v374_v30 = vsub.s32 %v1539_v46, %v1588_v3 }
  0xaf   : > { %v573_v35 = vsel %vm469_vm0, %v1627_v28, %v537_v22  ;;  %908 = vmatprep.subr.bf16.mxu0 %v681_v20  ;;  %v608_v38 = vsel %vm436_vm14, %v1623_v27, %v572_v2  ;;  %vm422_vm1 = vcmp.eq.s32.totalorder %v390_v26, 0  ;;  %vm454_vm4 = vcmp.eq.s32.totalorder %v390_v26, 1 }
  0xb0   : > { %v609_v42 = vsel %vm437_vm5, %v1623_v27, %v573_v35  ;;  %v644_v40 = vsel %vm404_vm10, %v1609_v18, %v608_v38  ;;  %vm423_vm7 = vcmp.eq.s32.totalorder %v391_v15, 0  ;;  %vm455_vm3 = vcmp.eq.s32.totalorder %v391_v15, 1 }
  0xb1   : > { %v645_v23 = vsel %vm405_vm6, %v1609_v18, %v609_v42  ;;  %vm486_vm8 = vcmp.eq.s32.totalorder %v390_v26, 16  ;;  %vm487_vm11 = vcmp.eq.s32.totalorder %v391_v15, 16  ;;  %vm518_vm13 = vcmp.eq.s32.totalorder %v390_v26, 17 }
  0xb2   : > { %v673_v41 = vpack.c.bf16 %v645_v23, %v644_v40  ;;  %vm519_vm15 = vcmp.eq.s32.totalorder %v391_v15, 17  ;;  %v554_v46 = vsel %vm518_vm13, %v1630_v34, 0.0  ;;  %v375_v43 = vsub.s32 %v1542_v47, %v1588_v3 }
  0xb3   : > { %vm406_vm14 = vcmp.eq.s32.totalorder %v374_v30, 0  ;;  %v555_v44 = vsel %vm519_vm15, %v1630_v34, 0.0  ;;  %v590_v45 = vsel %vm486_vm8, %v1627_v28, %v554_v46  ;;  %vm438_vm10 = vcmp.eq.s32.totalorder %v374_v30, 1 }
  0xb4   : > { %909 = vmatpush3.bf16.msra.mxu0 %v673_v41  ;;  %vm470_vm6 = vcmp.eq.s32.totalorder %v374_v30, 16  ;;  %v591_v48 = vsel %vm487_vm11, %v1627_v28, %v555_v44  ;;  %v626_v49 = vsel %vm454_vm4, %v1623_v27, %v590_v45  ;;  %vm407_vm5 = vcmp.eq.s32.totalorder %v375_v43, 0 }
  0xb5   : > { %vm439_vm12 = vcmp.eq.s32.totalorder %v375_v43, 1  ;;  %v627_v50 = vsel %vm455_vm3, %v1623_v27, %v591_v48  ;;  %v662_v47 = vsel %vm422_vm1, %v1609_v18, %v626_v49  ;;  %vm471_vm0 = vcmp.eq.s32.totalorder %v375_v43, 16 }
  0xb6   : > { %vm502_vm9 = vcmp.eq.s32.totalorder %v374_v30, 17  ;;  %v663_v31 = vsel %vm423_vm7, %v1609_v18, %v627_v50  ;;  %vm503_vm2 = vcmp.eq.s32.totalorder %v375_v43, 17  ;;  %v392_v32 = vsub.s32 %v1549_v51, %v1588_v3 }
  0xb7   : > { %v538_v55 = vsel %vm502_vm9, %v1630_v34, 0.0  ;;  %v682_v56 = vpack.c.bf16 %v663_v31, %v662_v47  ;;  %v539_v57 = vsel %vm503_vm2, %v1630_v34, 0.0  ;;  %v393_v62 = vsub.s32 %v1552_v52, %v1588_v3 }
  0xb8   : > { %v574_v59 = vsel %vm470_vm6, %v1627_v28, %v538_v55  ;;  %v575_v1 = vsel %vm471_vm0, %v1627_v28, %v539_v57  ;;  %vm424_vm1 = vcmp.eq.s32.totalorder %v392_v32, 0  ;;  %vm456_vm4 = vcmp.eq.s32.totalorder %v392_v32, 1 }
  0xb9   : > { %v610_v5 = vsel %vm438_vm10, %v1623_v27, %v574_v59  ;;  %910 = vmatprep.subr.bf16.mxu0 %v682_v56  ;;  %v611_v6 = vsel %vm439_vm12, %v1623_v27, %v575_v1  ;;  %vm425_vm7 = vcmp.eq.s32.totalorder %v393_v62, 0  ;;  %vm457_vm3 = vcmp.eq.s32.totalorder %v393_v62, 1 }
  0xba   : > { %v646_v51 = vsel %vm406_vm14, %v1609_v18, %v610_v5  ;;  %v647_v7 = vsel %vm407_vm5, %v1609_v18, %v611_v6  ;;  %vm488_vm8 = vcmp.eq.s32.totalorder %v392_v32, 16  ;;  %vm489_vm11 = vcmp.eq.s32.totalorder %v393_v62, 16 }
  0xbb   : > { %vm520_vm13 = vcmp.eq.s32.totalorder %v392_v32, 17  ;;  %v674_v52 = vpack.c.bf16 %v647_v7, %v646_v51  ;;  %vm521_vm15 = vcmp.eq.s32.totalorder %v393_v62, 17  ;;  %v376_v10 = vsub.s32 %v1555_v53, %v1588_v3 }
  0xbc   : > { %v556_v33 = vsel %vm520_vm13, %v1630_v34, 0.0  ;;  %v557_v36 = vsel %vm521_vm15, %v1630_v34, 0.0  ;;  %v377_v11 = vsub.s32 %v1558_v54, %v1588_v3  ;;  %v394_v12 = vsub.s32 %v1565_v58, %v1588_v3 }
  0xbd   : > { %v592_v37 = vsel %vm488_vm8, %v1627_v28, %v556_v33  ;;  %911 = vmatpush3.bf16.msra.mxu0 %v674_v52  ;;  %v593_v14 = vsel %vm489_vm11, %v1627_v28, %v557_v36  ;;  %vm408_vm14 = vcmp.eq.s32.totalorder %v376_v10, 0  ;;  %vm440_vm10 = vcmp.eq.s32.totalorder %v376_v10, 1 }
  0xbe   : > { %v628_v17 = vsel %vm456_vm4, %v1623_v27, %v592_v37  ;;  %v629_v53 = vsel %vm457_vm3, %v1623_v27, %v593_v14  ;;  %vm409_vm6 = vcmp.eq.s32.totalorder %v377_v11, 0  ;;  %vm441_vm5 = vcmp.eq.s32.totalorder %v377_v11, 1 }
  0xbf   : > { %v664_v24 = vsel %vm424_vm1, %v1609_v18, %v628_v17  ;;  %v665_v54 = vsel %vm425_vm7, %v1609_v18, %v629_v53  ;;  %vm472_vm12 = vcmp.eq.s32.totalorder %v376_v10, 16  ;;  %vm473_vm0 = vcmp.eq.s32.totalorder %v377_v11, 16 }
  0xc0   : > { %vm504_vm9 = vcmp.eq.s32.totalorder %v376_v10, 17  ;;  %v683_v58 = vpack.c.bf16 %v665_v54, %v664_v24  ;;  %vm505_vm2 = vcmp.eq.s32.totalorder %v377_v11, 17  ;;  %v395_v16 = vsub.s32 %v1571_v60, %v1588_v3 }
  0xc1   : > { %v540_v19 = vsel %vm504_vm9, %v1630_v34, 0.0  ;;  %v541_v25 = vsel %vm505_vm2, %v1630_v34, 0.0  ;;  %vm426_vm1 = vcmp.eq.s32.totalorder %v394_v12, 0  ;;  %vm458_vm4 = vcmp.eq.s32.totalorder %v394_v12, 1 }
  0xc2   : > { %v576_v39 = vsel %vm472_vm12, %v1627_v28, %v540_v19  ;;  %912 = vmatprep.subr.bf16.mxu0 %v683_v58  ;;  %v577_v29 = vsel %vm473_vm0, %v1627_v28, %v541_v25  ;;  %vm427_vm7 = vcmp.eq.s32.totalorder %v395_v16, 0  ;;  %vm459_vm3 = vcmp.eq.s32.totalorder %v395_v16, 1 }
  0xc3   : > { %v612_v20 = vsel %vm440_vm10, %v1623_v27, %v576_v39  ;;  %v613_v21 = vsel %vm441_vm5, %v1623_v27, %v577_v29  ;;  %vm490_vm8 = vcmp.eq.s32.totalorder %v394_v12, 16  ;;  %vm491_vm11 = vcmp.eq.s32.totalorder %v395_v16, 16 }
  0xc4   : > { %v648_v60 = vsel %vm408_vm14, %v1609_v18, %v612_v20  ;;  %v649_v22 = vsel %vm409_vm6, %v1609_v18, %v613_v21  ;;  %vm522_vm13 = vcmp.eq.s32.totalorder %v394_v12, 17  ;;  %vm523_vm15 = vcmp.eq.s32.totalorder %v395_v16, 17 }
  0xc5   : > { %v378_v26 = vsub.s32 %v1574_v61, %v1588_v3  ;;  %v675_v2 = vpack.c.bf16 %v649_v22, %v648_v60  ;;  %v558_v35 = vsel %vm522_vm13, %v1630_v34, 0.0  ;;  %v559_v15 = vsel %vm523_vm15, %v1630_v34, 0.0 }
  0xc6   : > { %v379_v30 = vsub.s32 %v1578_v63, %v1588_v3  ;;  %v594_v38 = vsel %vm490_vm8, %v1627_v28, %v558_v35  ;;  %v595_v42 = vsel %vm491_vm11, %v1627_v28, %v559_v15  ;;  %v311_v40 = vadd.s32 120, %v1478_v9 }
  0xc7   : > { %vm410_vm14 = vcmp.eq.s32.totalorder %v378_v26, 0  ;;  %913 = vmatpush3.bf16.msra.mxu0 %v675_v2  ;;  %v630_v23 = vsel %vm458_vm4, %v1623_v27, %v594_v38  ;;  %v631_v61 = vsel %vm459_vm3, %v1623_v27, %v595_v42  ;;  %vm442_vm10 = vcmp.eq.s32.totalorder %v378_v26, 1 }
  0xc8   : > { %vm443_vm6 = vcmp.eq.s32.totalorder %v379_v30, 1  ;;  %v666_v41 = vsel %vm426_vm1, %v1609_v18, %v630_v23  ;;  %v667_v63 = vsel %vm427_vm7, %v1609_v18, %v631_v61  ;;  %vm474_vm5 = vcmp.eq.s32.totalorder %v378_v26, 16 }
  0xc9   : > { %vm475_vm12 = vcmp.eq.s32.totalorder %v379_v30, 16  ;;  %v684_v46 = vpack.c.bf16 %v667_v63, %v666_v41  ;;  %vm506_vm0 = vcmp.eq.s32.totalorder %v378_v26, 17  ;;  %vm507_vm9 = vcmp.eq.s32.totalorder %v379_v30, 17 }
  0xca   : > { %v396_v9 = vsub.s32 %v1581_v0, %v1588_v3  ;;  %vm411_vm2 = vcmp.eq.s32.totalorder %v379_v30, 0  ;;  %v542_v43 = vsel %vm506_vm0, %v1630_v34, 0.0  ;;  %v543_v44 = vsel %vm507_vm9, %v1630_v34, 0.0 }
  0xcb   : > { %v397_v45 = vsub.s32 %v1591_v4, %v1588_v3  ;;  %914 = vmatprep.subr.bf16.mxu0 %v684_v46  ;;  %v578_v48 = vsel %vm474_vm5, %v1627_v28, %v542_v43  ;;  %v579_v49 = vsel %vm475_vm12, %v1627_v28, %v543_v44  ;;  %v380_v50 = vsub.s32 %v1595_v8, %v1588_v3 }
  0xcc   : > { %vm428_vm1 = vcmp.eq.s32.totalorder %v396_v9, 0  ;;  %v614_v0 = vsel %vm442_vm10, %v1623_v27, %v578_v48  ;;  %v615_v47 = vsel %vm443_vm6, %v1623_v27, %v579_v49  ;;  %vm460_vm4 = vcmp.eq.s32.totalorder %v396_v9, 1 }
  0xcd   : > { %vm461_vm7 = vcmp.eq.s32.totalorder %v397_v45, 1  ;;  %v650_v4 = vsel %vm410_vm14, %v1609_v18, %v614_v0  ;;  %v651_v31 = vsel %vm411_vm2, %v1609_v18, %v615_v47  ;;  %vm492_vm3 = vcmp.eq.s32.totalorder %v396_v9, 16 }
  0xce   : > { %vm493_vm8 = vcmp.eq.s32.totalorder %v397_v45, 16  ;;  %v676_v55 = vpack.c.bf16 %v651_v31, %v650_v4  ;;  %vm524_vm11 = vcmp.eq.s32.totalorder %v396_v9, 17  ;;  %vm525_vm13 = vcmp.eq.s32.totalorder %v397_v45, 17 }
  0xcf   : > { %v381_v8 = vsub.s32 %v311_v40, %v1588_v3  ;;  %vm429_vm15 = vcmp.eq.s32.totalorder %v397_v45, 0  ;;  %v560_v32 = vsel %vm524_vm11, %v1630_v34, 0.0  ;;  %v561_v56 = vsel %vm525_vm13, %v1630_v34, 0.0 }
  0xd0   : > { %vm412_vm10 = vcmp.eq.s32.totalorder %v380_v50, 0  ;;  %915 = vmatpush3.bf16.msra.mxu0 %v676_v55  ;;  %v596_v57 = vsel %vm492_vm3, %v1627_v28, %v560_v32  ;;  %v597_v59 = vsel %vm493_vm8, %v1627_v28, %v561_v56  ;;  %vm444_vm14 = vcmp.eq.s32.totalorder %v380_v50, 1 }
  0xd1   : > { %vm445_vm6 = vcmp.eq.s32.totalorder %v381_v8, 1  ;;  %v632_v62 = vsel %vm460_vm4, %v1623_v27, %v596_v57  ;;  %v633_v1 = vsel %vm461_vm7, %v1623_v27, %v597_v59  ;;  %vm476_vm5 = vcmp.eq.s32.totalorder %v380_v50, 16 }
  0xd2   : > { %vm477_vm12 = vcmp.eq.s32.totalorder %v381_v8, 16  ;;  %v668_v3 = vsel %vm428_vm1, %v1609_v18, %v632_v62  ;;  %v669_v5 = vsel %vm429_vm15, %v1609_v18, %v633_v1  ;;  %vm508_vm0 = vcmp.eq.s32.totalorder %v380_v50, 17 }
  0xd3   : > { %vm509_vm9 = vcmp.eq.s32.totalorder %v381_v8, 17  ;;  %v685_v6 = vpack.c.bf16 %v669_v5, %v668_v3  ;;  %vm413_vm2 = vcmp.eq.s32.totalorder %v381_v8, 0  ;;  %v544_v51 = vsel %vm508_vm0, %v1630_v34, 0.0 }
  0xd4   : > { %v545_v7 = vsel %vm509_vm9, %v1630_v34, 0.0  ;;  %v580_v52 = vsel %vm476_vm5, %v1627_v28, %v544_v51 }
  0xd5   : > { %v581_v33 = vsel %vm477_vm12, %v1627_v28, %v545_v7  ;;  %916 = vmatprep.subr.bf16.mxu0 %v685_v6  ;;  %v616_v10 = vsel %vm444_vm14, %v1623_v27, %v580_v52  ;;  %v686_v28 = vld [vmem:[#allocation2] sm:$0xf] }
  0xd6   : > { %v617_v36 = vsel %vm445_vm6, %v1623_v27, %v581_v33  ;;  %v652_v37 = vsel %vm412_vm10, %v1609_v18, %v616_v10 }
  0xd7   : > { %v653_v11 = vsel %vm413_vm2, %v1609_v18, %v617_v36 }
  0xd8   : > { %v677_v34 = vpack.c.bf16 %v653_v11, %v652_v37 }
  0xda   : > { %917 = vmatpush3.bf16.msra.mxu0 %v677_v34 }
  0xdd   : > { %732 = vmatmul.mubr.bf16.vlgmr.msra.gmra.mrb[0].mxu0 %v1480_v13 }
 0x1b0   : > { %v918_v12 = vpop.f32.mrb[0].mxu0 }
 0x1b1   : > { %v919_v14 = vpop.f32.mrb[1].mxu0 }
 0x1b2   : > { %v920_v17 = vadd.f32 %v919_v14, %v918_v12  ;;  %v921_v53 = vpop.f32.mrb[2].mxu0 }
 0x1b3   : > { %v922_v24 = vpop.f32.mrb[3].mxu0 }
 0x1b4   : > { %v739_v27 = vadd.f32 %v920_v17, %v686_v28 }
 0x1b6   : > { %740 = vst [vmem:[#allocation2] sm:$0xf] %v739_v27 }
 0x1bd   : > { %v744_v13 = vld [vmem:[#allocation2] sm:$0xf] }
 0x1be   : > { %745 = vst [vmem:[%s225_s3] sm:$0xf] %v744_v13 }
 0x1bf   : > { %1109 = shalt.err (!%p1106_p6)
}
 0x1c0   : > { %s1110_s25 = scalar_lea.hbm %s1897_s2, 64  ;;  %s1114_s28 = scalar_lea.hbm %s2000_s8, 256 }
 0x1c1   : > { %p1111_p11 = scmp.ne.s32.totalorder %s1897_s2, %s1110_s25  ;;  %p1115_p4 = scmp.lt.u32.totalorder %s1897_s2, %s2000_s8 }
 0x1c2   : > { %p1116_p12 = scmp.lt.u32.totalorder %s1114_s28, %s1110_s25  ;;  %p1118_p0 = scmp.lt.u32.totalorder %s1110_s25, %s1897_s2 }
 0x1c3   : > { %p1112_p8 = pnand %p1111_p11, %p2001_p3 }
 0x1c4   : > { %p1117_p9 = por %p1116_p12, %p1115_p4 }
 0x1c5   : > { %p1113_p13 = pneg %p1112_p8 }
 0x1c6   : > { %p1119_p2 = por %p1118_p0, %p1117_p9 }
 0x1c8   : > { %p1120_p5 = pnand %p1119_p2, %p1113_p13 }
 0x1ca   : > { %1123 = shalt.err (!%p1120_p5)
}
 0x1cb   : > { %932 = dma.vmem_to_hbm [thread:$0]  (%p2001_p3), %s1899_s9, 64, %s1897_s2, %s747_s6  }
 0x1cc PF: > { %s2002_s7 = sld [smem:[#allocation12_spill]]  ;;  %p946_p10 = scmp.ge.s32.totalorder %s1222_s19, 2 }
 0x1cd   : > { %p2003_p7 = scmp.ne.s32.totalorder %s1980_s4, 0 }
 0x1cf   : > { %p942_p1 = pnand %p946_p10, %p2003_p7 }
 0x1d2   : > { %s774_s3 = sand.u32 1, %s2002_s7  }
 0x1d3   : > { %s775_s23 = scalar_lea.sflag [#allocation5], %s774_s3 }
 0x1d4   : > { %1177 = dma.done.wait (!%p942_p1), %s775_s23, 64  }
 0x1d5   : > { %1179 = vsyncadd (!%p942_p1), %s775_s23, 4294967232  ;;  %s21_s19 = sadd.s32 1, %s1222_s19   ;;  %s2004_s29 = sld [smem:[#allocation13_spill]] }
 0x1d6   : > { %p18_p6 = scmp.ge.s32.totalorder %s21_s19, 6   ;;  %s2005_s2 = sld [smem:[#allocation14_spill]] }
 0x1d7   : > { %s2006_s9 = smov %s1186_s10  ;;  %s2007_s10 = smov %s1190_s11 }
 0x1d8   : > { %s2008_s11 = smov %s1406_s26  ;;  %s2009_s12 = smov %s1198_s13 }
 0x1d9   : > { %s2010_s13 = smov %s1202_s14  ;;  %s2011_s14 = smov %s1347_s5 }
 0x1da   : > { %s2012_s15 = smov %s1214_s17  ;;  %s2013_s16 = smov %s1218_s18 }
 0x1db   : > { %s2014_s17 = smov %s2004_s29  ;;  %20 = sbr.rel (!%p18_p6) target bundleno = 13 (0xd), region = 94 }
 0x1dc   : > { %s2015_s18 = smov %s2005_s2 }
 0x1e2   :  { %780 = vsyncpa [#allocation4], 1 }
 0x1e3   :  { %782 = vsyncpa [#allocation4 + $0x1], 1 }
 0x1e4   :  { %783 = vsyncpa [#allocation7], 1 }
 0x1e5   :  { %785 = vsyncpa [#allocation7 + $0x1], 1 }
 0x1e6   :  { %786 = vsyncpa [#allocation5], 1 }
 0x1e7   :  { %788 = vsyncpa [#allocation5 + $0x1], 1 }

</bundles_post_ra>
